<compile_context>
chip_gen: v5e
topology: v5e:2x2
jax: 0.10.0
libtpu: 0.0.40
codegen_flags: <defaults>
</compile_context>

<pallas_src>
import functools

import jax
import jax.numpy as jnp
from jax.experimental import pallas as pl
from jax.experimental.pallas import tpu as pltpu

BN_EPS = 1e-5
LEAKY_SLOPE = 0.01
_VMEM_BUDGET_BYTES = 44 * 1024 * 1024   # v7x-safe (64 MiB physical) with headroom
_VMEM_LIMIT_BYTES = 48 * 1024 * 1024


def _round_up(x, m):
    return ((x + m - 1) // m) * m


def _leaky_relu(h):
    return jnp.where(h >= 0.0, h, LEAKY_SLOPE * h)


def mlp_kernel(x_ref, w1_ref, w2_ref, bn_ref, w3_ref, b3_ref, o_ref,
               h_buf, stats, *, n_valid, block_rows, compute_dtype):
    """Three-pass fused MLP.

    grid = (3, num_tiles); pass axis p is outermost, N-tile axis i is innermost.
      p == 0 : h1 = x @ W1              -> h_buf tile ; accumulate sum/sumsq of h1
      p == 1 : bn1+lrelu(h1) @ W2       -> h_buf tile ; accumulate sum/sumsq of h2
      p == 2 : bn2+lrelu(h2) @ W3 + b3  -> output tile
    """
    p = pl.program_id(0)
    i = pl.program_id(1)
    n_pad = h_buf.shape[0]
    row0 = pl.multiple_of(i * block_rows, block_rows)
    rows = pl.ds(row0, block_rows)
    inv_n = 1.0 / n_valid                                   # static python float

    def mask_pad_rows(h):
        # Zero contributions from padded batch rows (only needed when N was padded).
        if n_pad == n_valid:
            return h
        gid = row0 + jax.lax.broadcasted_iota(jnp.int32, (block_rows, 1), 0)
        return jnp.where(gid < n_valid, h, 0.0)

    def accumulate(h, sum_slot, sq_slot):
        stats[sum_slot:sum_slot + 1, :] += jnp.sum(h, axis=0, keepdims=True)
        stats[sq_slot:sq_slot + 1, :] += jnp.sum(h * h, axis=0, keepdims=True)

    def folded_bn(sum_slot, sq_slot, g_slot, b_slot):
        # One-pass, clamped variance folded with the BN affine:
        #   s = gamma * rsqrt(var + eps), t = beta - mu * s, bn(h) = h * s + t
        mu = stats[sum_slot:sum_slot + 1, :] * inv_n
        var = jnp.maximum(stats[sq_slot:sq_slot + 1, :] * inv_n - mu * mu, 0.0)
        s = bn_ref[g_slot:g_slot + 1, :] * jax.lax.rsqrt(var + BN_EPS)   # EUP
        t = bn_ref[b_slot:b_slot + 1, :] - mu * s
        return s, t

    @pl.when(p == 0)
    def _pass0():
        @pl.when(i == 0)
        def _init():
            stats[...] = jnp.zeros_like(stats)

        x = x_ref[...].astype(compute_dtype)
        h = jnp.dot(x, w1_ref[...], preferred_element_type=jnp.float32)
        h = mask_pad_rows(h)
        h_buf[rows, :] = h
        accumulate(h, 0, 1)

    @pl.when(p == 1)
    def _pass1():
        s, t = folded_bn(0, 1, 0, 1)
        h = _leaky_relu(h_buf[rows, :] * s + t)
        h = jnp.dot(h.astype(compute_dtype), w2_ref[...],
                    preferred_element_type=jnp.float32)
        h = mask_pad_rows(h)
        h_buf[rows, :] = h
        accumulate(h, 2, 3)

    @pl.when(p == 2)
    def _pass2():
        s, t = folded_bn(2, 3, 2, 3)
        h = _leaky_relu(h_buf[rows, :] * s + t)
        out = jnp.dot(h.astype(compute_dtype), w3_ref[...],
                      preferred_element_type=jnp.float32) + b3_ref[...]
        o_ref[...] = out.astype(o_ref.dtype)


def make_params(key, input_size, hidden, output_size):
    """Deterministic parameter init (PyTorch-like uniform bounds 1/sqrt(fan_in)).

    BN gamma/beta are randomized (instead of 1/0) so the folded affine path is tested.
    """
    ks = jax.random.split(key, 10)

    def linear(kw, kb, fan_in, fan_out):
        bound = 1.0 / jnp.sqrt(jnp.float32(fan_in))
        w = jax.random.uniform(kw, (fan_in, fan_out), jnp.float32, -bound, bound)
        b = jax.random.uniform(kb, (1, fan_out), jnp.float32, -bound, bound)
        return w, b

    w1, b1 = linear(ks[0], ks[1], input_size, hidden)
    w2, b2 = linear(ks[2], ks[3], hidden, hidden)
    w3, b3 = linear(ks[4], ks[5], hidden, output_size)
    g1 = jax.random.uniform(ks[6], (1, hidden), jnp.float32, 0.5, 1.5)
    be1 = jax.random.uniform(ks[7], (1, hidden), jnp.float32, -0.5, 0.5)
    g2 = jax.random.uniform(ks[8], (1, hidden), jnp.float32, 0.5, 1.5)
    be2 = jax.random.uniform(ks[9], (1, hidden), jnp.float32, -0.5, 0.5)
    return dict(w1=w1, b1=b1, g1=g1, be1=be1,
                w2=w2, b2=b2, g2=g2, be2=be2,
                w3=w3, b3=b3)


def prepare_params(params, *, compute_dtype=jnp.bfloat16):
    """One-time, out-of-the-hot-path parameter prep:
      * pack the four BN vectors into one (4, hidden) operand (single DMA),
      * pad the final projection lane-dense (multiple of 128 columns),
      * cast matmul weights to the MXU compute dtype (bf16 on v6e/v7x),
      * drop b1/b2 (cancelled exactly by BN batch-mean subtraction).
    """
    hidden = params["w1"].shape[1]
    output_size = params["w3"].shape[1]
    out_pad = _round_up(output_size, 128)
    w3_pad = jnp.zeros((hidden, out_pad), jnp.float32).at[:, :output_size].set(params["w3"])
    b3_pad = jnp.zeros((1, out_pad), jnp.float32).at[:, :output_size].set(params["b3"])
    bn_pack = jnp.concatenate(
        [params["g1"], params["be1"], params["g2"], params["be2"]],
        axis=0).astype(jnp.float32)                          # (4, hidden): g1, be1, g2, be2
    return dict(
        w1=params["w1"].astype(compute_dtype),
        w2=params["w2"].astype(compute_dtype),
        w3=w3_pad.astype(compute_dtype),
        b3=b3_pad,                                           # f32, added after f32 accumulate
        bn=bn_pack,
        output_size=output_size,
        compute_dtype=compute_dtype,
    )


@functools.partial(jax.jit,
                   static_argnames=("output_size", "block_rows", "compute_dtype"))
def _mlp_forward_impl(x, w1, w2, bn, w3, b3, *, output_size, block_rows, compute_dtype):
    n, input_size = x.shape
    hidden = w1.shape[1]
    out_pad = w3.shape[1]

    if block_rows is None:
        # Single tile for small batches; >= 512 rows otherwise so the ~0.35us/step
        # grid overhead and MXU push latency amortize.
        block_rows = _round_up(n, 8) if n <= 512 else 512
    assert block_rows % 8 == 0 and block_rows > 0

    n_pad = _round_up(n, block_rows)
    if n_pad != n:
        x = jnp.pad(x, ((0, n_pad - n), (0, 0)))             # zero rows; masked in-kernel
    num_tiles = n_pad // block_rows

    # Explicit VMEM guard, budget derived for v7x's 64 MiB physical VMEM.
    # TODO(synk): HBM-streamed intermediate for batches beyond this ceiling.
    cd_bytes = jnp.dtype(compute_dtype).itemsize
    vmem_needed = (
        n_pad * hidden * 4                                    # h_buf scratch
        + 4 * hidden * 4                                      # stats scratch
        + (input_size * hidden + hidden * hidden + hidden * out_pad) * cd_bytes  # weights
        + 4 * hidden * 4 + out_pad * 4                        # bn pack + b3
        + 2 * block_rows * (input_size + out_pad) * 4         # double-buffered x / out tiles
    )
    if vmem_needed > _VMEM_BUDGET_BYTES:
        raise ValueError(
            f"MLP batch of {n} rows needs ~{vmem_needed / 2**20:.1f} MiB VMEM "
            f"(> {_VMEM_BUDGET_BYTES / 2**20:.0f} MiB budget); reduce the batch "
            f"or switch to an HBM-streamed intermediate.")

    kernel = functools.partial(
        mlp_kernel, n_valid=n, block_rows=block_rows, compute_dtype=compute_dtype)

    # Weights / BN / bias: constant index maps -> DMA'd once, VMEM-resident.
    # x is only consumed in pass 0 and the output only produced in pass 2; pin their
    # block index to 0 on the other passes to avoid redundant fetches / writebacks.
    const = lambda p, i: (0, 0)
    in_specs = [
        pl.BlockSpec((block_rows, input_size),
                     lambda p, i: (jnp.where(p == 0, i, 0), 0)),
        pl.BlockSpec(w1.shape, const),
        pl.BlockSpec(w2.shape, const),
        pl.BlockSpec(bn.shape, const),
        pl.BlockSpec(w3.shape, const),
        pl.BlockSpec(b3.shape, const),
    ]
    out_specs = pl.BlockSpec((block_rows, out_pad),
                             lambda p, i: (jnp.where(p == 2, i, 0), 0))

    flops = (2 * n_pad * (input_size * hidden + hidden * hidden + hidden * out_pad)
             + 12 * n_pad * hidden)
    bytes_accessed = (n_pad * input_size * 4
                      + (input_size * hidden + hidden * hidden + hidden * out_pad) * cd_bytes
                      + (4 * hidden + out_pad) * 4
                      + n_pad * out_pad * 4)
    transcendentals = 2 * hidden * num_tiles

    out_full = pl.pallas_call(
        kernel,
        out_shape=jax.ShapeDtypeStruct((n_pad, out_pad), jnp.float32),
        grid_spec=pltpu.PrefetchScalarGridSpec(
            num_scalar_prefetch=0,
            grid=(3, num_tiles),
            in_specs=in_specs,
            out_specs=out_specs,
            scratch_shapes=[
                pltpu.VMEM((n_pad, hidden), jnp.float32),     # layer intermediate (reused)
                pltpu.VMEM((4, hidden), jnp.float32),         # sum1, sumsq1, sum2, sumsq2
            ],
        ),
        compiler_params=pltpu.CompilerParams(
            # Both axes are sequential: passes communicate through the scratch refs.
            dimension_semantics=("arbitrary", "arbitrary"),
            vmem_limit_bytes=_VMEM_LIMIT_BYTES),
        cost_estimate=pl.CostEstimate(
            flops=flops,
            transcendentals=transcendentals,
            bytes_accessed=bytes_accessed),
    )(x, w1, w2, bn, w3, b3)

    return out_full[:n, :output_size]


def mlp_forward(x, prepared, block_rows=None):
    return _mlp_forward_impl(
        x, prepared["w1"], prepared["w2"], prepared["bn"], prepared["w3"], prepared["b3"],
        output_size=prepared["output_size"],
        block_rows=block_rows,
        compute_dtype=prepared["compute_dtype"])


def mlp_reference(x, p, compute_dtype=jnp.float32):
    """Pure-JAX reference of the PyTorch forward (training-mode BN, with biases)."""
    def dot(a, w):
        return jnp.dot(a.astype(compute_dtype), w.astype(compute_dtype),
                       preferred_element_type=jnp.float32)

    def bn_lrelu(h, g, b):
        mu = jnp.mean(h, axis=0, keepdims=True)
        var = jnp.mean((h - mu) ** 2, axis=0, keepdims=True)
        h = (h - mu) / jnp.sqrt(var + BN_EPS) * g + b
        return jnp.where(h >= 0, h, LEAKY_SLOPE * h)

    h = dot(x, p["w1"]) + p["b1"]
    h = bn_lrelu(h, p["g1"], p["be1"])
    h = dot(h, p["w2"]) + p["b2"]
    h = bn_lrelu(h, p["g2"], p["be2"])
    return dot(h, p["w3"]) + p["b3"]


if __name__ == "__main__":
    # MLP(input_size=16, output_size=32, hidden=128, num_of_layer=2), batch of 24.
    batch, input_size, hidden, output_size = 24, 16, 128, 32

    key = jax.random.PRNGKey(0)
    kx, kp = jax.random.split(key)
    x = jax.random.normal(kx, (batch, input_size), jnp.float32)
    params = make_params(kp, input_size, hidden, output_size)

    # 1) f32 path, forced multi-tile (3 tiles of 8 rows): exact-semantics check.
    prep_f32 = prepare_params(params, compute_dtype=jnp.float32)
    out = jax.block_until_ready(mlp_forward(x, prep_f32, block_rows=8))
    ref = mlp_reference(x, params)
    assert out.shape == (batch, output_size)
    assert jnp.allclose(out, ref, atol=1e-4, rtol=1e-4), "f32 mismatch vs reference"

    # 2) Ragged batch (N not a multiple of the row tile -> padding + masking path).
    x_odd = x[:20]
    out_odd = jax.block_until_ready(mlp_forward(x_odd, prep_f32, block_rows=8))
    ref_odd = mlp_reference(x_odd, params)
    assert out_odd.shape == (20, output_size)
    assert jnp.allclose(out_odd, ref_odd, atol=1e-4, rtol=1e-4), "ragged-N mismatch"

    # 3) bf16 MXU fast path (f32 accumulate, f32 BN/LeakyReLU math), default tiling.
    prep_bf16 = prepare_params(params, compute_dtype=jnp.bfloat16)
    out_bf16 = jax.block_until_ready(mlp_forward(x, prep_bf16))
    ref_bf16 = mlp_reference(x, params, compute_dtype=jnp.bfloat16)
    assert jnp.allclose(out_bf16, ref_bf16, atol=1e-2, rtol=1e-2), "bf16 mismatch"

    print("KERNEL_OK")
</pallas_src>

<mosaic_0001>
module attributes {stable_mosaic.version = 11 : i64} {
  func.func @mlp_kernel(%arg0: i32, %arg1: i32, %arg2: memref<8x16xf32, #tpu.memory_space<vmem>>, %arg3: memref<16x128xf32, #tpu.memory_space<vmem>>, %arg4: memref<128x128xf32, #tpu.memory_space<vmem>>, %arg5: memref<4x128xf32, #tpu.memory_space<vmem>>, %arg6: memref<128x128xf32, #tpu.memory_space<vmem>>, %arg7: memref<1x128xf32, #tpu.memory_space<vmem>>, %arg8: memref<8x128xf32, #tpu.memory_space<vmem>>, %arg9: memref<24x128xf32, #tpu.memory_space<vmem>>, %arg10: memref<4x128xf32, #tpu.memory_space<vmem>>) attributes {dimension_semantics = [#tpu.dimension_semantics<arbitrary>, #tpu.dimension_semantics<arbitrary>], iteration_bounds = array<i64: 3, 3>, scalar_prefetch = 0 : i64, scratch_operands = 2 : i64, tpu.core_type = #tpu.core_type<tc>, window_params = [{transform_indices = @transform_0, window_bounds = array<i64: 8, 16>}, {pipeline_mode = #tpu.pipeline_mode<synchronous>, transform_indices = @transform_1, window_bounds = array<i64: 16, 128>}, {pipeline_mode = #tpu.pipeline_mode<synchronous>, transform_indices = @transform_2, window_bounds = array<i64: 128, 128>}, {pipeline_mode = #tpu.pipeline_mode<synchronous>, transform_indices = @transform_3, window_bounds = array<i64: 4, 128>}, {pipeline_mode = #tpu.pipeline_mode<synchronous>, transform_indices = @transform_4, window_bounds = array<i64: 128, 128>}, {pipeline_mode = #tpu.pipeline_mode<synchronous>, transform_indices = @transform_5, window_bounds = array<i64: 1, 128>}, {transform_indices = @transform_6, window_bounds = array<i64: 8, 128>}]} {
    %c8_i32 = arith.constant 8 : i32
    %0 = arith.muli %arg1, %c8_i32 : i32
    %1 = tpu.assume_multiple %0, 8 : i32
    %c0_i32 = arith.constant 0 : i32
    %2 = arith.cmpi eq, %arg0, %c0_i32 : i32
    %3 = arith.extui %2 : i1 to i32
    %c0_i32_0 = arith.constant 0 : i32
    %4 = arith.cmpi ne, %3, %c0_i32_0 : i32
    scf.if %4 {
      %c0_i32_3 = arith.constant 0 : i32
      %11 = arith.cmpi eq, %arg1, %c0_i32_3 : i32
      %12 = arith.extui %11 : i1 to i32
      %c0_i32_4 = arith.constant 0 : i32
      %13 = arith.cmpi ne, %12, %c0_i32_4 : i32
      scf.if %13 {
        %cst_18 = arith.constant 0.000000e+00 : f32
        %30 = vector.broadcast %cst_18 : f32 to vector<4x128xf32>
        %c0_19 = arith.constant 0 : index
        %c0_20 = arith.constant 0 : index
        %31 = vector.load %arg10[%c0_19, %c0_20] : memref<4x128xf32, #tpu.memory_space<vmem>>, vector<4x128xf32>
        tpu.vector_store %arg10[%c0_19, %c0_20], %30 {strides = array<i32>} : memref<4x128xf32, #tpu.memory_space<vmem>>, vector<4x128xf32>,
      } else {
      }
      %c0 = arith.constant 0 : index
      %c0_5 = arith.constant 0 : index
      %14 = vector.load %arg2[%c0, %c0_5] : memref<8x16xf32, #tpu.memory_space<vmem>>, vector<8x16xf32>
      %c0_6 = arith.constant 0 : index
      %c0_7 = arith.constant 0 : index
      %15 = vector.load %arg3[%c0_6, %c0_7] : memref<16x128xf32, #tpu.memory_space<vmem>>, vector<16x128xf32>
      %cst = arith.constant dense<0.000000e+00> : vector<8x128xf32>
      %16 = tpu.matmul %14, %15, %cst {dimension_numbers = #tpu.dot_dimension_numbers<[1], [0], [0], [1], [0, 0, 1, 1], [], []>} : vector<8x16xf32>, vector<16x128xf32>, vector<8x128xf32> -> vector<8x128xf32>
      %17 = arith.index_cast %1 : i32 to index
      %c0_8 = arith.constant 0 : index
      %18 = vector.load %arg9[%17, %c0_8] : memref<24x128xf32, #tpu.memory_space<vmem>>, vector<8x128xf32>
      tpu.vector_store %arg9[%17, %c0_8], %16 {strides = array<i32>} : memref<24x128xf32, #tpu.memory_space<vmem>>, vector<8x128xf32>,
      %c0_9 = arith.constant 0 : index
      %c0_10 = arith.constant 0 : index
      %19 = vector.load %arg10[%c0_9, %c0_10] : memref<4x128xf32, #tpu.memory_space<vmem>>, vector<1x128xf32>
      %cst_11 = arith.constant dense<0.000000e+00> : vector<128xf32>
      %20 = vector.multi_reduction <add>, %16, %cst_11 [0] : vector<8x128xf32> to vector<128xf32>
      %21 = vector.shape_cast %20 : vector<128xf32> to vector<1x128xf32>
      %22 = arith.addf %19, %21 : vector<1x128xf32>
      %c0_12 = arith.constant 0 : index
      %c0_13 = arith.constant 0 : index
      %23 = vector.load %arg10[%c0_12, %c0_13] : memref<4x128xf32, #tpu.memory_space<vmem>>, vector<1x128xf32>
      tpu.vector_store %arg10[%c0_12, %c0_13], %22 {strides = array<i32>} : memref<4x128xf32, #tpu.memory_space<vmem>>, vector<1x128xf32>,
      %c1 = arith.constant 1 : index
      %c0_14 = arith.constant 0 : index
      %24 = vector.load %arg10[%c1, %c0_14] : memref<4x128xf32, #tpu.memory_space<vmem>>, vector<1x128xf32>
      %25 = arith.mulf %16, %16 : vector<8x128xf32>
      %cst_15 = arith.constant dense<0.000000e+00> : vector<128xf32>
      %26 = vector.multi_reduction <add>, %25, %cst_15 [0] : vector<8x128xf32> to vector<128xf32>
      %27 = vector.shape_cast %26 : vector<128xf32> to vector<1x128xf32>
      %28 = arith.addf %24, %27 : vector<1x128xf32>
      %c1_16 = arith.constant 1 : index
      %c0_17 = arith.constant 0 : index
      %29 = vector.load %arg10[%c1_16, %c0_17] : memref<4x128xf32, #tpu.memory_space<vmem>>, vector<1x128xf32>
      tpu.vector_store %arg10[%c1_16, %c0_17], %28 {strides = array<i32>} : memref<4x128xf32, #tpu.memory_space<vmem>>, vector<1x128xf32>,
    } else {
    }
    %c1_i32 = arith.constant 1 : i32
    %5 = arith.cmpi eq, %arg0, %c1_i32 : i32
    %6 = arith.extui %5 : i1 to i32
    %c0_i32_1 = arith.constant 0 : i32
    %7 = arith.cmpi ne, %6, %c0_i32_1 : i32
    scf.if %7 {
      %c0 = arith.constant 0 : index
      %c0_3 = arith.constant 0 : index
      %11 = vector.load %arg10[%c0, %c0_3] : memref<4x128xf32, #tpu.memory_space<vmem>>, vector<1x128xf32>
      %cst = arith.constant 0.0416666679 : f32
      %12 = vector.broadcast %cst : f32 to vector<1x128xf32>
      %13 = arith.mulf %11, %12 : vector<1x128xf32>
      %c1 = arith.constant 1 : index
      %c0_4 = arith.constant 0 : index
      %14 = vector.load %arg10[%c1, %c0_4] : memref<4x128xf32, #tpu.memory_space<vmem>>, vector<1x128xf32>
      %cst_5 = arith.constant 0.0416666679 : f32
      %15 = vector.broadcast %cst_5 : f32 to vector<1x128xf32>
      %16 = arith.mulf %14, %15 : vector<1x128xf32>
      %17 = arith.mulf %13, %13 : vector<1x128xf32>
      %18 = arith.subf %16, %17 : vector<1x128xf32>
      %cst_6 = arith.constant 0.000000e+00 : f32
      %19 = vector.broadcast %cst_6 : f32 to vector<1x128xf32>
      %20 = arith.maximumf %18, %19 : vector<1x128xf32>
      %c0_7 = arith.constant 0 : index
      %c0_8 = arith.constant 0 : index
      %21 = vector.load %arg5[%c0_7, %c0_8] : memref<4x128xf32, #tpu.memory_space<vmem>>, vector<1x128xf32>
      %cst_9 = arith.constant 9.99999974E-6 : f32
      %22 = vector.broadcast %cst_9 : f32 to vector<1x128xf32>
      %23 = arith.addf %20, %22 : vector<1x128xf32>
      %24 = math.rsqrt %23 : vector<1x128xf32>
      %25 = arith.mulf %21, %24 : vector<1x128xf32>
      %c1_10 = arith.constant 1 : index
      %c0_11 = arith.constant 0 : index
      %26 = vector.load %arg5[%c1_10, %c0_11] : memref<4x128xf32, #tpu.memory_space<vmem>>, vector<1x128xf32>
      %27 = arith.mulf %13, %25 : vector<1x128xf32>
      %28 = arith.subf %26, %27 : vector<1x128xf32>
      %29 = arith.index_cast %1 : i32 to index
      %c0_12 = arith.constant 0 : index
      %30 = vector.load %arg9[%29, %c0_12] : memref<24x128xf32, #tpu.memory_space<vmem>>, vector<8x128xf32>
      %31 = vector.broadcast %25 : vector<1x128xf32> to vector<8x128xf32>
      %32 = arith.mulf %30, %31 : vector<8x128xf32>
      %33 = vector.broadcast %28 : vector<1x128xf32> to vector<8x128xf32>
      %34 = arith.addf %32, %33 : vector<8x128xf32>
      %cst_13 = arith.constant 0.000000e+00 : f32
      %35 = vector.broadcast %cst_13 : f32 to vector<8x128xf32>
      %36 = arith.cmpf oge, %34, %35 : vector<8x128xf32>
      %cst_14 = arith.constant 0.00999999977 : f32
      %37 = vector.broadcast %cst_14 : f32 to vector<8x128xf32>
      %38 = arith.mulf %37, %34 : vector<8x128xf32>
      %39 = arith.select %36, %34, %38 : vector<8x128xi1>, vector<8x128xf32>
      %c0_15 = arith.constant 0 : index
      %c0_16 = arith.constant 0 : index
      %40 = vector.load %arg4[%c0_15, %c0_16] : memref<128x128xf32, #tpu.memory_space<vmem>>, vector<128x128xf32>
      %cst_17 = arith.constant dense<0.000000e+00> : vector<8x128xf32>
      %41 = tpu.matmul %39, %40, %cst_17 {dimension_numbers = #tpu.dot_dimension_numbers<[1], [0], [0], [1], [0, 0, 1, 1], [], []>} : vector<8x128xf32>, vector<128x128xf32>, vector<8x128xf32> -> vector<8x128xf32>
      %42 = arith.index_cast %1 : i32 to index
      %c0_18 = arith.constant 0 : index
      %43 = vector.load %arg9[%42, %c0_18] : memref<24x128xf32, #tpu.memory_space<vmem>>, vector<8x128xf32>
      tpu.vector_store %arg9[%42, %c0_18], %41 {strides = array<i32>} : memref<24x128xf32, #tpu.memory_space<vmem>>, vector<8x128xf32>,
      %c2 = arith.constant 2 : index
      %c0_19 = arith.constant 0 : index
      %44 = vector.load %arg10[%c2, %c0_19] : memref<4x128xf32, #tpu.memory_space<vmem>>, vector<1x128xf32>
      %cst_20 = arith.constant dense<0.000000e+00> : vector<128xf32>
      %45 = vector.multi_reduction <add>, %41, %cst_20 [0] : vector<8x128xf32> to vector<128xf32>
      %46 = vector.shape_cast %45 : vector<128xf32> to vector<1x128xf32>
      %47 = arith.addf %44, %46 : vector<1x128xf32>
      %c2_21 = arith.constant 2 : index
      %c0_22 = arith.constant 0 : index
      %48 = vector.load %arg10[%c2_21, %c0_22] : memref<4x128xf32, #tpu.memory_space<vmem>>, vector<1x128xf32>
      tpu.vector_store %arg10[%c2_21, %c0_22], %47 {strides = array<i32>} : memref<4x128xf32, #tpu.memory_space<vmem>>, vector<1x128xf32>,
      %c3 = arith.constant 3 : index
      %c0_23 = arith.constant 0 : index
      %49 = vector.load %arg10[%c3, %c0_23] : memref<4x128xf32, #tpu.memory_space<vmem>>, vector<1x128xf32>
      %50 = arith.mulf %41, %41 : vector<8x128xf32>
      %cst_24 = arith.constant dense<0.000000e+00> : vector<128xf32>
      %51 = vector.multi_reduction <add>, %50, %cst_24 [0] : vector<8x128xf32> to vector<128xf32>
      %52 = vector.shape_cast %51 : vector<128xf32> to vector<1x128xf32>
      %53 = arith.addf %49, %52 : vector<1x128xf32>
      %c3_25 = arith.constant 3 : index
      %c0_26 = arith.constant 0 : index
      %54 = vector.load %arg10[%c3_25, %c0_26] : memref<4x128xf32, #tpu.memory_space<vmem>>, vector<1x128xf32>
      tpu.vector_store %arg10[%c3_25, %c0_26], %53 {strides = array<i32>} : memref<4x128xf32, #tpu.memory_space<vmem>>, vector<1x128xf32>,
    } else {
    }
    %c2_i32 = arith.constant 2 : i32
    %8 = arith.cmpi eq, %arg0, %c2_i32 : i32
    %9 = arith.extui %8 : i1 to i32
    %c0_i32_2 = arith.constant 0 : i32
    %10 = arith.cmpi ne, %9, %c0_i32_2 : i32
    scf.if %10 {
      %c2 = arith.constant 2 : index
      %c0 = arith.constant 0 : index
      %11 = vector.load %arg10[%c2, %c0] : memref<4x128xf32, #tpu.memory_space<vmem>>, vector<1x128xf32>
      %cst = arith.constant 0.0416666679 : f32
      %12 = vector.broadcast %cst : f32 to vector<1x128xf32>
      %13 = arith.mulf %11, %12 : vector<1x128xf32>
      %c3 = arith.constant 3 : index
      %c0_3 = arith.constant 0 : index
      %14 = vector.load %arg10[%c3, %c0_3] : memref<4x128xf32, #tpu.memory_space<vmem>>, vector<1x128xf32>
      %cst_4 = arith.constant 0.0416666679 : f32
      %15 = vector.broadcast %cst_4 : f32 to vector<1x128xf32>
      %16 = arith.mulf %14, %15 : vector<1x128xf32>
      %17 = arith.mulf %13, %13 : vector<1x128xf32>
      %18 = arith.subf %16, %17 : vector<1x128xf32>
      %cst_5 = arith.constant 0.000000e+00 : f32
      %19 = vector.broadcast %cst_5 : f32 to vector<1x128xf32>
      %20 = arith.maximumf %18, %19 : vector<1x128xf32>
      %c2_6 = arith.constant 2 : index
      %c0_7 = arith.constant 0 : index
      %21 = vector.load %arg5[%c2_6, %c0_7] : memref<4x128xf32, #tpu.memory_space<vmem>>, vector<1x128xf32>
      %cst_8 = arith.constant 9.99999974E-6 : f32
      %22 = vector.broadcast %cst_8 : f32 to vector<1x128xf32>
      %23 = arith.addf %20, %22 : vector<1x128xf32>
      %24 = math.rsqrt %23 : vector<1x128xf32>
      %25 = arith.mulf %21, %24 : vector<1x128xf32>
      %c3_9 = arith.constant 3 : index
      %c0_10 = arith.constant 0 : index
      %26 = vector.load %arg5[%c3_9, %c0_10] : memref<4x128xf32, #tpu.memory_space<vmem>>, vector<1x128xf32>
      %27 = arith.mulf %13, %25 : vector<1x128xf32>
      %28 = arith.subf %26, %27 : vector<1x128xf32>
      %29 = arith.index_cast %1 : i32 to index
      %c0_11 = arith.constant 0 : index
      %30 = vector.load %arg9[%29, %c0_11] : memref<24x128xf32, #tpu.memory_space<vmem>>, vector<8x128xf32>
      %31 = vector.broadcast %25 : vector<1x128xf32> to vector<8x128xf32>
      %32 = arith.mulf %30, %31 : vector<8x128xf32>
      %33 = vector.broadcast %28 : vector<1x128xf32> to vector<8x128xf32>
      %34 = arith.addf %32, %33 : vector<8x128xf32>
      %cst_12 = arith.constant 0.000000e+00 : f32
      %35 = vector.broadcast %cst_12 : f32 to vector<8x128xf32>
      %36 = arith.cmpf oge, %34, %35 : vector<8x128xf32>
      %cst_13 = arith.constant 0.00999999977 : f32
      %37 = vector.broadcast %cst_13 : f32 to vector<8x128xf32>
      %38 = arith.mulf %37, %34 : vector<8x128xf32>
      %39 = arith.select %36, %34, %38 : vector<8x128xi1>, vector<8x128xf32>
      %c0_14 = arith.constant 0 : index
      %c0_15 = arith.constant 0 : index
      %40 = vector.load %arg6[%c0_14, %c0_15] : memref<128x128xf32, #tpu.memory_space<vmem>>, vector<128x128xf32>
      %cst_16 = arith.constant dense<0.000000e+00> : vector<8x128xf32>
      %41 = tpu.matmul %39, %40, %cst_16 {dimension_numbers = #tpu.dot_dimension_numbers<[1], [0], [0], [1], [0, 0, 1, 1], [], []>} : vector<8x128xf32>, vector<128x128xf32>, vector<8x128xf32> -> vector<8x128xf32>
      %c0_17 = arith.constant 0 : index
      %c0_18 = arith.constant 0 : index
      %42 = vector.load %arg7[%c0_17, %c0_18] : memref<1x128xf32, #tpu.memory_space<vmem>>, vector<1x128xf32>
      %43 = vector.broadcast %42 : vector<1x128xf32> to vector<8x128xf32>
      %44 = arith.addf %41, %43 : vector<8x128xf32>
      %c0_19 = arith.constant 0 : index
      %c0_20 = arith.constant 0 : index
      %45 = vector.load %arg8[%c0_19, %c0_20] : memref<8x128xf32, #tpu.memory_space<vmem>>, vector<8x128xf32>
      tpu.vector_store %arg8[%c0_19, %c0_20], %44 {strides = array<i32>} : memref<8x128xf32, #tpu.memory_space<vmem>>, vector<8x128xf32>,
    } else {
    }
    return
  }
  func.func @transform_0(%arg0: i32, %arg1: i32) -> (i32, i32) {
    %c0_i32 = arith.constant 0 : i32
    %0 = arith.cmpi eq, %arg0, %c0_i32 : i32
    %c0_i32_0 = arith.constant 0 : i32
    %1 = arith.select %0, %arg1, %c0_i32_0 : i32
    %c0_i32_1 = arith.constant 0 : i32
    %c0_i32_2 = arith.constant 0 : i32
    return %1, %c0_i32_1 : i32, i32
  }
  func.func @transform_1(%arg0: i32, %arg1: i32) -> (i32, i32) {
    %c0_i32 = arith.constant 0 : i32
    %c0_i32_0 = arith.constant 0 : i32
    %c0_i32_1 = arith.constant 0 : i32
    return %c0_i32, %c0_i32_0 : i32, i32
  }
  func.func @transform_2(%arg0: i32, %arg1: i32) -> (i32, i32) {
    %c0_i32 = arith.constant 0 : i32
    %c0_i32_0 = arith.constant 0 : i32
    %c0_i32_1 = arith.constant 0 : i32
    return %c0_i32, %c0_i32_0 : i32, i32
  }
  func.func @transform_3(%arg0: i32, %arg1: i32) -> (i32, i32) {
    %c0_i32 = arith.constant 0 : i32
    %c0_i32_0 = arith.constant 0 : i32
    %c0_i32_1 = arith.constant 0 : i32
    return %c0_i32, %c0_i32_0 : i32, i32
  }
  func.func @transform_4(%arg0: i32, %arg1: i32) -> (i32, i32) {
    %c0_i32 = arith.constant 0 : i32
    %c0_i32_0 = arith.constant 0 : i32
    %c0_i32_1 = arith.constant 0 : i32
    return %c0_i32, %c0_i32_0 : i32, i32
  }
  func.func @transform_5(%arg0: i32, %arg1: i32) -> (i32, i32) {
    %c0_i32 = arith.constant 0 : i32
    %c0_i32_0 = arith.constant 0 : i32
    %c0_i32_1 = arith.constant 0 : i32
    return %c0_i32, %c0_i32_0 : i32, i32
  }
  func.func @transform_6(%arg0: i32, %arg1: i32) -> (i32, i32) {
    %c2_i32 = arith.constant 2 : i32
    %0 = arith.cmpi eq, %arg0, %c2_i32 : i32
    %c0_i32 = arith.constant 0 : i32
    %1 = arith.select %0, %arg1, %c0_i32 : i32
    %c0_i32_0 = arith.constant 0 : i32
    %c0_i32_1 = arith.constant 0 : i32
    return %1, %c0_i32_0 : i32, i32
  }
}

</mosaic_0001>

<bundles_post_ra>
// kernel: _mlp_forward_impl.1
= control target key start
LH: loop header
LB: loop body
LE: loop exit
PB: predicated region body
PF: predicated region fallthrough
CT: control target
= control target key end

     0   :  { %11 = vsyncpa [#allocation5], 0  ;;  %s1171_s0 = inlined_call_operand.vmem [shape: f32[24,16], index: 0, kind: input, shape index: {}]   ;;  %s1172_s1 = inlined_call_operand.vmem [shape: f32[16,128], index: 1, kind: input, shape index: {}]   ;;  %s1173_s2 = inlined_call_operand.hbm [shape: f32[128,128], index: 2, kind: input, shape index: {}]   ;;  %s1174_s3 = inlined_call_operand.vmem [shape: f32[4,128], index: 3, kind: input, shape index: {}]   ;;  %s1175_s4 = inlined_call_operand.hbm [shape: f32[128,128], index: 4, kind: input, shape index: {}]   ;;  %s1176_s5 = inlined_call_operand.vmem [shape: f32[1,128], index: 5, kind: input, shape index: {}]   ;;  %s1177_s6 = inlined_call_operand.hbm [shape: f32[24,128], index: 6, kind: output, shape index: {}]  }
   0x1   :  { %12 = vsyncpa [#allocation8], 0 }
   0x2   :  { %13 = vsyncpa [#allocation6], 0 }
   0x3   :  { %15 = vsyncpa [#allocation6 + $0x1], 0  ;;  %s981_s21 = smov 0   ;;  %s983_s22 = smov 0  }
   0x4   :  { %s985_s23 = smov 0   ;;  %s987_s24 = smov 0  }
   0x5   :  { %s989_s25 = smov 0   ;;  %s991_s26 = smov 0  }
   0x6   :  { %s993_s27 = smov 0   ;;  %s995_s28 = smov 0  }
   0x7 LB: > { %1181 = sst [smem:[#allocation13_spill]] %s935_s27  ;;  %s656_s29 = sadd.s32 4294967295, %s939_s28   ;;  %s939_s28 = sphi %s995_s28, %s21_s28   ;;  %s935_s27 = sphi %s993_s27, %s1190_s27   ;;  %s931_s26 = sphi %s991_s26, %s1195_s26   ;;  %s927_s25 = sphi %s989_s25, %s1188_s25   ;;  %s923_s24 = sphi %s987_s24, %s1194_s24   ;;  %s919_s23 = sphi %s985_s23, %s1193_s23   ;;  %s915_s22 = sphi %s983_s22, %s1192_s22   ;;  %s911_s21 = sphi %s981_s21, %s1191_s21  }
   0x8   : > { %s657_s30 = sadd.s32 4294967294, %s939_s28   ;;  %s30_s7 = sadd.s32 1, %s931_s26 }
   0x9   : > { %s33_s8 = sadd.s32 1, %s935_s27  ;;  %p31_p0 = scmp.ge.s32.totalorder %s30_s7, 3 }
   0xa   : > { %p172_p1 = scmp.eq.s32.totalorder %s935_s27, 2  ;;  %s179_s9 = sadd.s32 1, %s919_s23 }
   0xb   : > { %p189_p2 = scmp.ne.s32.totalorder %s919_s23, %s915_s22  ;;  %s1197_s7 = smov (%p31_p0, %s30_s7), 0 }
   0xc   : > { %1182 = sst [smem:[#allocation14_spill]] %s1197_s7  ;;  %s1199_s8 = smov (!%p31_p0, %s33_s8), %s935_s27 }
   0xd   : > { %s173_s10 = scalar_select %p172_p1, %s931_s26, 0 }
   0xe   : > { %p35_p3 = scmp.ge.s32.totalorder %s1199_s8, 3  ;;  %p190_p4 = scmp.eq.s32.totalorder %s656_s29, 8 }
   0xf   : > { %p195_p5 = scmp.ne.s32.totalorder %s915_s22, %s911_s21  ;;  %p196_p6 = scmp.eq.s32.totalorder %s657_s30, 8 }
  0x10   : > { %s1201_s8 = smov (%p35_p3, %s1199_s8), 0  ;;  %p1037_p7 = por %p190_p4, %p189_p2 }
  0x11   : > { %1183 = sst [smem:[#allocation15_spill]] %s1201_s8  ;;  %p1041_p8 = por %p196_p6, %p195_p5 }
  0x12   : > { %p174_p9 = scmp.eq.s32.totalorder %s1201_s8, 2  ;;  %p658_p10 = scmp.ge.s32.totalorder %s939_s28, 1 }
  0x13   : > { %p203_p11 = scmp.lt.s32.totalorder %s939_s28, 10  ;;  %p1053_p13 = scmp.eq.s32.totalorder %s656_s29, 0 }
  0x14   : > { %s175_s13 = scalar_select %p174_p9, %s1197_s7, 0 }
  0x15   : > { %p1049_p12 = pnand %p658_p10, %p203_p11  ;;  %s217_s19 = sshll.u32 %s1173_s2, 4  ;;  %s218_s19 = int_to_ptr.hbm [resolvable:$true] %s217_s19 }
  0x16   : > { %s176_s16 = ssub.s32 %s173_s10, %s175_s13  ;;  %s941_s30 = smov [#allocation4]  }
  0x17   : > { %p177_p0 = scmp.eq.s32.totalorder %s176_s16, 0  ;;  %p687_p1 = pneg %p1049_p12 }
  0x18   : > { %s219_s8 = sshll.u32 %s941_s30, 4  ;;  %s942_s29 = smov 128   ;;  %s220_s8 = int_to_ptr.vmem [resolvable:$true] %s219_s8 }
  0x19   : > { %s1063_s20 = scalar_select %p177_p0, %s919_s23, %s179_s9  }
  0x1a   : > { %p688_p2 = pnand %p1053_p13, %p687_p1  ;;  %s943_s7 = smov 8  }
  0x1b   : > { %s234_s13 = sshll.u32 %s1175_s4, 4  ;;  %s944_s17 = smov [#allocation7]   ;;  %s235_s13 = int_to_ptr.hbm [resolvable:$true] %s234_s13 }
  0x1c   : > { %690 = dma.hbm_to_vmem [thread:$0]  (!%p688_p2), %s218_s19, 2048, %s220_s8, [#allocation5], %s942_s29, %s942_s29, %s943_s7  }
  0x1d   : > { %s236_s16 = sshll.u32 %s944_s17, 4  ;;  %266 = sbr.rel (%p1049_p12) target bundleno = 591 (0x24f), region = 44  ;;  %s237_s16 = int_to_ptr.vmem [resolvable:$true] %s236_s16 }
  0x1e   : > { %693 = dma.hbm_to_vmem [thread:$0]  (!%p688_p2), %s235_s13, 2048, %s237_s16, [#allocation8], %s942_s29, %s942_s29, %s943_s7  }
  0x22   : > { %898 = dma.done.wait (%p1053_p13), [#allocation5], 2048  }
  0x23   : > { %900 = vsyncadd (%p1053_p13), [#allocation5], 4294965248 }
  0x24   : > { %902 = dma.done.wait (%p1053_p13), [#allocation8], 2048  }
  0x25   : > { %904 = vsyncadd (%p1053_p13), [#allocation8], 4294965248  ;;  %s300_s27 = sand.u32 1, %s915_s22   ;;  %p303_p3 = scmp.eq.s32.totalorder %s927_s25, 0 }
  0x26   : > { %s1084_s7 = sshll.u32 %s300_s27, 3  ;;  %s1087_s8 = sshll.u32 %s923_s24, 3 }
  0x27   : > { %s304_s9 = scalar_select %p303_p3, %s923_s24, 0 }
  0x28   : > { %s302_s30 = scalar_lea.vmem [#allocation9], %s1084_s7  ;;  %p668_p5 = scmp.ne.s32.totalorder %s927_s25, 0 }
  0x29   : > { %p305_p4 = scmp.lt.s32.totalorder %s304_s9, 2  ;;  %p669_p6 = scmp.ne.s32.totalorder (!%p668_p5), %s923_s24, 0 }
  0x2a   : > { %317 = sbr.rel (%p668_p5) target bundleno = 201 (0xc9), region = 56 }
  0x2b   : > { %s1203_s9 = smov (!%p305_p4, %s304_s9), 2 }
  0x2c   : > { %s666_s14 = sshll.u32 %s1203_s9, 3 }
  0x2d   : > { %s308_s19 = scalar_lea.vmem %s1171_s0, %s666_s14 }
  0x2f   : > { %321 = sbr.rel (%p669_p6) target bundleno = 54 (0x36), region = 60 }
  0x34   : > { %v945_v0 = vmov 0.0  }
  0x35   : > { %322 = vst [vmem:[#allocation3] sm:$0xf] %v945_v0 }
  0x36 PF: > { %v325_v1 = vld [vmem:[%s1172_s1 + $0x8] sm:$0xff]  ;;  %v324_v2 = vld [vmem:[%s1172_s1] sm:$0xff]  ;;  %vm326_vm0 = vcmask 130048   ;;  %s350_s16 = scalar_lea.vmem [#allocation2], %s1087_s8 }
  0x37   : > { %344 = vmatpush.msra.mxu0 %v325_v1  ;;  %v323_v3 = vld [vmem:[%s308_s19] sm:$0xff] }
  0x39   : > { %345 = vmatpush.msra.mxu0 %v324_v2 }
  0x3a   : > { %670 = vmatmul.msk.f32.vlgmr.msra.gmra.mxu0 %vm326_vm0, %v323_v3 }
  0x3c   : > { %v352_v15 = vld [vmem:[#allocation3] sm:$0x1]  ;;  %v361_v18 = vld [vmem:[#allocation3 + $0x1] sm:$0x1] }
  0xb7   : > { %v347_v4 = vpop.f32.mrf.mxu0 }
  0xb8   : > { %351 = vst [vmem:[%s350_s16] sm:$0xff] %v347_v4  ;;  %v353_v5 = vrot.slane %v347_v4, 4  ;;  %v362_v6 = vmul.f32 %v347_v4, %v347_v4 }
  0xba   : > { %v354_v7 = vadd.f32 %v353_v5, %v347_v4  ;;  %v363_v8 = vrot.slane %v362_v6, 4 }
  0xbc   : > { %v355_v9 = vrot.slane %v354_v7, 2  ;;  %v364_v10 = vadd.f32 %v363_v8, %v362_v6 }
  0xbe   : > { %v356_v11 = vadd.f32 %v355_v9, %v354_v7  ;;  %v365_v12 = vrot.slane %v364_v10, 2 }
  0xc0   : > { %v357_v13 = vrot.slane %v356_v11, 1  ;;  %v366_v14 = vadd.f32 %v365_v12, %v364_v10 }
  0xc2   : > { %v358_v16 = vadd.f32 %v357_v13, %v356_v11  ;;  %v367_v17 = vrot.slane %v366_v14, 1 }
  0xc4   : > { %v359_v19 = vadd.f32 %v358_v16, %v352_v15  ;;  %v368_v20 = vadd.f32 %v367_v17, %v366_v14 }
  0xc6   : > { %360 = vst [vmem:[#allocation3] sm:$0x1] %v359_v19  ;;  %v369_v21 = vadd.f32 %v368_v20, %v361_v18 }
  0xc8   : > { %370 = vst [vmem:[#allocation3 + $0x1] sm:$0x1] %v369_v21 }
  0xc9 PF: > { %p671_p9 = scmp.ne.s32.totalorder %s927_s25, 1 }
  0xca   : > { %s398_s19 = scalar_lea.vmem (!%p671_p9), [#allocation2], %s1087_s8 }
  0xcb   : > { %374 = sbr.rel (%p671_p9) target bundleno = 394 (0x18a), region = 64 }
  0xd0   : > { %v422_v22 = vld [vmem:[#allocation4 + $0x78] sm:$0xff]  ;;  %v421_v23 = vld [vmem:[#allocation4 + $0x70] sm:$0xff]  ;;  %v420_v24 = vld [vmem:[#allocation4 + $0x68] sm:$0xff] }
  0xd1   : > { %423 = vmatpush.msra.mxu0 %v422_v22  ;;  %v419_v25 = vld [vmem:[#allocation4 + $0x60] sm:$0xff]  ;;  %v375_v26 = vld [vmem:[#allocation3] sm:$0x1]  ;;  %v377_v27 = vld [vmem:[#allocation3 + $0x1] sm:$0x1] }
  0xd2   : > { %v418_v28 = vld [vmem:[#allocation4 + $0x58] sm:$0xff]  ;;  %v376_v29 = vmul.f32 0.041666668, %v375_v26  ;;  %v378_v30 = vmul.f32 0.041666668, %v377_v27  ;;  %v417_v31 = vld [vmem:[#allocation4 + $0x50] sm:$0xff] }
  0xd3   : > { %424 = vmatpush.msra.mxu0 %v421_v23  ;;  %v416_v33 = vld [vmem:[#allocation4 + $0x48] sm:$0xff]  ;;  %v415_v35 = vld [vmem:[#allocation4 + $0x40] sm:$0xff]  ;;  %v414_v37 = vld [vmem:[#allocation4 + $0x38] sm:$0xff] }
  0xd4   : > { %v379_v32 = vmul.f32 %v376_v29, %v376_v29  ;;  %v413_v39 = vld [vmem:[#allocation4 + $0x30] sm:$0xff]  ;;  %v412_v40 = vld [vmem:[#allocation4 + $0x28] sm:$0xff]  ;;  %v411_v41 = vld [vmem:[#allocation4 + $0x20] sm:$0xff] }
  0xd5   : > { %425 = vmatpush.msra.mxu0 %v420_v24  ;;  %v410_v43 = vld [vmem:[#allocation4 + $0x18] sm:$0xff]  ;;  %v409_v45 = vld [vmem:[#allocation4 + $0x10] sm:$0xff]  ;;  %v408_v47 = vld [vmem:[#allocation4 + $0x8] sm:$0xff] }
  0xd6   : > { %v380_v34 = vsub.f32 %v378_v30, %v379_v32  ;;  %v407_v49 = vld [vmem:[#allocation4] sm:$0xff]  ;;  %v444_v12 = vld [vmem:[#allocation3 + $0x2] sm:$0x1]  ;;  %v453_v15 = vld [vmem:[#allocation3 + $0x3] sm:$0x1] }
  0xd7   : > { %426 = vmatpush.msra.mxu0 %v419_v25  ;;  %v382_v51 = vld [vmem:[%s1174_s3] sm:$0x1]  ;;  %v395_v55 = vld [vmem:[%s1174_s3 + $0x1] sm:$0x1] }
  0xd8   : > { %v381_v36 = vmax.f32 %v380_v34, 0.0  ;;  %v399_v56 = vld [vmem:[%s398_s19] sm:$0xff] }
  0xd9   : > { %427 = vmatpush.msra.mxu0 %v418_v28 }
  0xda   : > { %v383_v38 = vadd.f32 1e-05, %v381_v36 }
  0xdb   : > { %428 = vmatpush.msra.mxu0 %v417_v31 }
  0xdc   : > { %772 = vrsqrt.f32 %v383_v38  ;;  %vm390_vm1 = vweird.f32 %v383_v38 }
  0xdd   : > { %429 = vmatpush.msra.mxu0 %v416_v33 }
  0xdf   : > { %430 = vmatpush.msra.mxu0 %v415_v35 }
  0xe1   : > { %431 = vmatpush.msra.mxu0 %v414_v37 }
  0xe2   : > { %v773_v42 = vpop.eup %772 }
  0xe3   : > { %432 = vmatpush.msra.mxu0 %v413_v39  ;;  %v385_v44 = vmul.f32 %v773_v42, %v383_v38  ;;  %vm391_vm2 = vweird.f32 %v773_v42 }
  0xe4   : > { %vm392_vm3 = vmor %vm390_vm1, %vm391_vm2 }
  0xe5   : > { %433 = vmatpush.msra.mxu0 %v412_v40  ;;  %v386_v46 = vmul.f32 %v773_v42, %v385_v44 }
  0xe7   : > { %434 = vmatpush.msra.mxu0 %v411_v41  ;;  %v387_v48 = vmul.f32 0.5, %v386_v46 }
  0xe9   : > { %435 = vmatpush.msra.mxu0 %v410_v43  ;;  %v388_v50 = vsub.f32 1.5, %v387_v48 }
  0xeb   : > { %436 = vmatpush.msra.mxu0 %v409_v45  ;;  %v389_v52 = vmul.f32 %v773_v42, %v388_v50 }
  0xed   : > { %437 = vmatpush.msra.mxu0 %v408_v47  ;;  %v393_v53 = vsel %vm392_vm3, %v773_v42, %v389_v52 }
  0xee   : > { %v394_v54 = vmul.f32 %v393_v53, %v382_v51 }
  0xef   : > { %438 = vmatpush.msra.mxu0 %v407_v49 }
  0xf0   : > { %v396_v57 = vmul.f32 %v394_v54, %v376_v29  ;;  %v400_v58 = vperm.slane %v394_v54, 0 }
  0xf2   : > { %v397_v59 = vsub.f32 %v395_v55, %v396_v57  ;;  %v401_v60 = vmul.f32 %v400_v58, %v399_v56 }
  0xf4   : > { %v402_v61 = vperm.slane %v397_v59, 0 }
  0xf6   : > { %v403_v62 = vadd.f32 %v402_v61, %v401_v60 }
  0xf8   : > { %vm404_vm4 = vcmp.ge.f32.partialorder %v403_v62, 0.0  ;;  %v405_v63 = vmul.f32 0.01, %v403_v62 }
  0xfa   : > { %v406_v0 = vsel %vm404_vm4, %v403_v62, %v405_v63 }
  0xfb   : > { %439 = vmatmul.f32.vlgmr.msra.gmra.mxu0 %v406_v0 }
 0x178   : > { %v440_v1 = vpop.f32.mrf.mxu0 }
 0x179   : > { %443 = vst [vmem:[%s398_s19] sm:$0xff] %v440_v1  ;;  %v445_v2 = vrot.slane %v440_v1, 4  ;;  %v454_v3 = vmul.f32 %v440_v1, %v440_v1 }
 0x17b   : > { %v446_v4 = vadd.f32 %v445_v2, %v440_v1  ;;  %v455_v5 = vrot.slane %v454_v3, 4 }
 0x17d   : > { %v447_v6 = vrot.slane %v446_v4, 2  ;;  %v456_v7 = vadd.f32 %v455_v5, %v454_v3 }
 0x17f   : > { %v448_v8 = vadd.f32 %v447_v6, %v446_v4  ;;  %v457_v9 = vrot.slane %v456_v7, 2 }
 0x181   : > { %v449_v10 = vrot.slane %v448_v8, 1  ;;  %v458_v11 = vadd.f32 %v457_v9, %v456_v7 }
 0x183   : > { %v450_v13 = vadd.f32 %v449_v10, %v448_v8  ;;  %v459_v14 = vrot.slane %v458_v11, 1 }
 0x185   : > { %v451_v16 = vadd.f32 %v450_v13, %v444_v12  ;;  %v460_v17 = vadd.f32 %v459_v14, %v458_v11 }
 0x187   : > { %452 = vst [vmem:[#allocation3 + $0x2] sm:$0x1] %v451_v16  ;;  %v461_v18 = vadd.f32 %v460_v17, %v453_v15 }
 0x189   : > { %462 = vst [vmem:[#allocation3 + $0x3] sm:$0x1] %v461_v18 }
 0x18a PF: > { %p672_p10 = scmp.ne.s32.totalorder %s927_s25, 2 }
 0x18b   : > { %s490_s16 = scalar_lea.vmem (!%p672_p10), [#allocation2], %s1087_s8 }
 0x18c   : > { %466 = sbr.rel (%p672_p10) target bundleno = 573 (0x23d), region = 68 }
 0x191   : > { %v514_v19 = vld [vmem:[#allocation7 + $0x78] sm:$0xff]  ;;  %v513_v20 = vld [vmem:[#allocation7 + $0x70] sm:$0xff]  ;;  %v512_v21 = vld [vmem:[#allocation7 + $0x68] sm:$0xff] }
 0x192   : > { %519 = vmatpush.msra.mxu0 %v514_v19  ;;  %v511_v22 = vld [vmem:[#allocation7 + $0x60] sm:$0xff]  ;;  %v467_v23 = vld [vmem:[#allocation3 + $0x2] sm:$0x1]  ;;  %v469_v24 = vld [vmem:[#allocation3 + $0x3] sm:$0x1] }
 0x193   : > { %v510_v25 = vld [vmem:[#allocation7 + $0x58] sm:$0xff]  ;;  %v468_v26 = vmul.f32 0.041666668, %v467_v23  ;;  %v470_v27 = vmul.f32 0.041666668, %v469_v24  ;;  %v509_v28 = vld [vmem:[#allocation7 + $0x50] sm:$0xff] }
 0x194   : > { %520 = vmatpush.msra.mxu0 %v513_v20  ;;  %v508_v30 = vld [vmem:[#allocation7 + $0x48] sm:$0xff]  ;;  %v507_v32 = vld [vmem:[#allocation7 + $0x40] sm:$0xff]  ;;  %v506_v34 = vld [vmem:[#allocation7 + $0x38] sm:$0xff] }
 0x195   : > { %v471_v29 = vmul.f32 %v468_v26, %v468_v26  ;;  %v505_v36 = vld [vmem:[#allocation7 + $0x30] sm:$0xff]  ;;  %v504_v37 = vld [vmem:[#allocation7 + $0x28] sm:$0xff]  ;;  %v503_v38 = vld [vmem:[#allocation7 + $0x20] sm:$0xff] }
 0x196   : > { %521 = vmatpush.msra.mxu0 %v512_v21  ;;  %v502_v40 = vld [vmem:[#allocation7 + $0x18] sm:$0xff]  ;;  %v501_v42 = vld [vmem:[#allocation7 + $0x10] sm:$0xff]  ;;  %v500_v44 = vld [vmem:[#allocation7 + $0x8] sm:$0xff] }
 0x197   : > { %v472_v31 = vsub.f32 %v470_v27, %v471_v29  ;;  %v499_v46 = vld [vmem:[#allocation7] sm:$0xff] }
 0x198   : > { %522 = vmatpush.msra.mxu0 %v511_v22  ;;  %v474_v48 = vld [vmem:[%s1174_s3 + $0x2] sm:$0x1]  ;;  %v487_v52 = vld [vmem:[%s1174_s3 + $0x3] sm:$0x1]  ;;  %v774_v62 = vld [vmem:[%s1176_s5] ss:$0 sm:$0xff] }
 0x199   : > { %v473_v33 = vmax.f32 %v472_v31, 0.0  ;;  %v491_v53 = vld [vmem:[%s490_s16] sm:$0xff] }
 0x19a   : > { %523 = vmatpush.msra.mxu0 %v510_v25 }
 0x19b   : > { %v475_v35 = vadd.f32 1e-05, %v473_v33 }
 0x19c   : > { %524 = vmatpush.msra.mxu0 %v509_v28 }
 0x19d   : > { %775 = vrsqrt.f32 %v475_v35  ;;  %vm482_vm5 = vweird.f32 %v475_v35 }
 0x19e   : > { %525 = vmatpush.msra.mxu0 %v508_v30 }
 0x1a0   : > { %526 = vmatpush.msra.mxu0 %v507_v32 }
 0x1a2   : > { %527 = vmatpush.msra.mxu0 %v506_v34 }
 0x1a3   : > { %v776_v39 = vpop.eup %775 }
 0x1a4   : > { %528 = vmatpush.msra.mxu0 %v505_v36  ;;  %v477_v41 = vmul.f32 %v776_v39, %v475_v35  ;;  %vm483_vm6 = vweird.f32 %v776_v39 }
 0x1a5   : > { %vm484_vm7 = vmor %vm482_vm5, %vm483_vm6 }
 0x1a6   : > { %529 = vmatpush.msra.mxu0 %v504_v37  ;;  %v478_v43 = vmul.f32 %v776_v39, %v477_v41 }
 0x1a8   : > { %530 = vmatpush.msra.mxu0 %v503_v38  ;;  %v479_v45 = vmul.f32 0.5, %v478_v43 }
 0x1aa   : > { %531 = vmatpush.msra.mxu0 %v502_v40  ;;  %v480_v47 = vsub.f32 1.5, %v479_v45 }
 0x1ac   : > { %532 = vmatpush.msra.mxu0 %v501_v42  ;;  %v481_v49 = vmul.f32 %v776_v39, %v480_v47 }
 0x1ae   : > { %533 = vmatpush.msra.mxu0 %v500_v44  ;;  %v485_v50 = vsel %vm484_vm7, %v776_v39, %v481_v49 }
 0x1af   : > { %v486_v51 = vmul.f32 %v485_v50, %v474_v48 }
 0x1b0   : > { %534 = vmatpush.msra.mxu0 %v499_v46 }
 0x1b1   : > { %v488_v54 = vmul.f32 %v486_v51, %v468_v26  ;;  %v492_v55 = vperm.slane %v486_v51, 0 }
 0x1b3   : > { %v489_v56 = vsub.f32 %v487_v52, %v488_v54  ;;  %v493_v57 = vmul.f32 %v492_v55, %v491_v53 }
 0x1b5   : > { %v494_v58 = vperm.slane %v489_v56, 0 }
 0x1b7   : > { %v495_v59 = vadd.f32 %v494_v58, %v493_v57 }
 0x1b9   : > { %vm496_vm8 = vcmp.ge.f32.partialorder %v495_v59, 0.0  ;;  %v497_v60 = vmul.f32 0.01, %v495_v59 }
 0x1bb   : > { %v498_v61 = vsel %vm496_vm8, %v495_v59, %v497_v60 }
 0x1bc   : > { %535 = vmatmul.f32.vlgmr.msra.gmra.mxu0 %v498_v61 }
 0x239   : > { %v536_v63 = vpop.f32.mrf.mxu0 }
 0x23a   : > { %v537_v0 = vadd.f32 %v774_v62, %v536_v63 }
 0x23c   : > { %539 = vst [vmem:[%s302_s30] sm:$0xff] %v537_v0 }
 0x23d PF: > { %p548_p11 = scmp.eq.s32.totalorder %s927_s25, 2  ;;  %s555_s8 = sshll.u32 %s302_s30, 4  ;;  %s556_s8 = int_to_ptr.vmem [resolvable:$true] %s555_s8 }
 0x23e   : > { %s541_s13 = scalar_lea.sflag [#allocation6], %s300_s27 }
 0x23f   : > { %s1205_s24 = smov (!%p548_p11, %s923_s24), 0 }
 0x240   : > { %s674_s18 = sshll.u32 %s1205_s24, 3  ;;  %s857_s24 = scalar_lea.hbm %s1177_s6, 24 }
 0x241   : > { %s553_s29 = scalar_lea.hbm %s1177_s6, %s674_s18 }
 0x242   : > { %s557_s10 = sshll.u32 %s553_s29, 4  ;;  %s558_s10 = int_to_ptr.hbm [resolvable:$true] %s557_s10 }
 0x243   : > { %s851_s17 = sshra.s32 %s558_s10, 4  ;;  %s852_s17 = int_to_ptr.hbm [resolvable:$true] %s851_s17 }
 0x244   : > { %s853_s16 = scalar_lea.hbm %s852_s17, 8  ;;  %p858_p1 = scmp.lt.s32.totalorder %s852_s17, %s1177_s6 }
 0x245   : > { %p854_p12 = scmp.ne.s32.totalorder %s852_s17, %s853_s16  ;;  %p859_p2 = scmp.lt.s32.totalorder %s857_s24, %s853_s16 }
 0x247   : > { %p855_p13 = pnand %p854_p12, %p1037_p7  ;;  %p860_p3 = por %p859_p2, %p858_p1 }
 0x249   : > { %p856_p0 = pneg %p855_p13 }
 0x24b   : > { %p861_p4 = pnand %p860_p3, %p856_p0 }
 0x24d   : > { %864 = shalt.err (!%p861_p4)
}
 0x24e   : > { %685 = dma.vmem_to_hbm [thread:$0]  (%p1037_p7), %s556_s8, 128, %s558_s10, %s541_s13  }
 0x24f PF: > { %p702_p5 = scmp.ge.s32.totalorder %s939_s28, 2  ;;  %s569_s27 = sand.u32 1, %s911_s21  }
 0x250   : > { %s570_s14 = scalar_lea.sflag [#allocation6], %s569_s27 }
 0x251   : > { %p695_p6 = pnand %p702_p5, %p1041_p8 }
 0x253   : > { %p696_p9 = pneg %p695_p6 }
 0x255   : > { %906 = dma.done.wait (%p696_p9), %s570_s14, 128  }
 0x256   : > { %908 = vsyncadd (%p696_p9), %s570_s14, 4294967168  ;;  %s21_s28 = sadd.s32 1, %s939_s28   ;;  %s1188_s25 = sld [smem:[#allocation13_spill]] }
 0x257   : > { %p18_p10 = scmp.ge.s32.totalorder %s21_s28, 11   ;;  %s1189_s11 = sld [smem:[#allocation14_spill]] }
 0x258   : > { %s1190_s27 = sld [smem:[#allocation15_spill]]  ;;  %s1191_s21 = smov %s915_s22 }
 0x259   : > { %s1192_s22 = smov %s919_s23  ;;  %s1193_s23 = smov %s1063_s20 }
 0x25a   : > { %s1194_s24 = smov %s931_s26  ;;  %20 = sbr.rel (!%p18_p10) target bundleno = 7 (0x7), region = 107 }
 0x25d   : > { %s1195_s26 = smov %s1189_s11 }
 0x25f   :  { %576 = vsyncpa [#allocation5], 1 }
 0x260   :  { %578 = vsyncpa [#allocation5 + $0x1], 1 }
 0x261   :  { %579 = vsyncpa [#allocation8], 1 }
 0x262   :  { %580 = vsyncpa [#allocation6], 1 }
 0x263   :  { %582 = vsyncpa [#allocation6 + $0x1], 1 }

</bundles_post_ra>
